<compile_context>
chip_gen: v7x
topology: tpu7x:2x2x1
jax: 0.10.0
libtpu: 0.0.40
codegen_flags: <defaults>
</compile_context>

<pallas_src>
from functools import partial

import jax
import jax.numpy as jnp
from jax import lax
from jax.experimental import pallas as pl
from jax.experimental.pallas import tpu as pltpu


def _round_up(x: int, m: int) -> int:
    return (x + m - 1) // m * m


def _cdiv(a: int, b: int) -> int:
    return -(-a // b)


def _vmem_capacity_bytes() -> int:
    """Physical VMEM per TensorCore; conservative fallback works on v5e/v6e/v7x."""
    try:
        return int(pltpu.get_tpu_info().vmem_capacity_bytes)
    except Exception:
        return 64 << 20  # v7x per-TC capacity; safe lower bound for v5e/v6e too.


def _select_tiles(m: int, n: int, op_itemsize: int, vmem_cap: int,
                  tm_max: int, tn_max: int):
    """Pick (tm, tn, m_pad, n_pad, n_i, n_k) minimizing padding within the VMEM budget."""
    budget = int(0.70 * vmem_cap)          # leave headroom for compiler-internal scratch
    fixed_budget = int(0.60 * budget)      # (tn,tn) accumulator + double-buffered output tile

    # Feature tile: lane-dense, as large as the f32 accumulator/output budget allows
    # (tn=2048 on v5e/v6e's 128 MiB VMEM, tn=1024 on v7x's 64 MiB).
    tn_t = min(tn_max, _round_up(n, 128))
    while tn_t > 128 and 3 * tn_t * tn_t * 4 > fixed_budget:
        tn_t = max(128, tn_t // 2)
    n_i = _cdiv(n, tn_t)
    tn = _round_up(_cdiv(n, n_i), 128)     # minimal-padding tile, multiple of 128
    n_pad = n_i * tn

    # Row (contraction) tile: as large as the remaining budget allows; big tm
    # amortizes the accumulator RMW and per-grid-step overhead.
    fixed_bytes = 3 * tn * tn * 4 + 4 * tn * 4
    tm_t = min(tm_max, _round_up(m, 8))
    while tm_t > 256 and 4 * tm_t * tn * op_itemsize + fixed_bytes > budget:
        tm_t = max(8, tm_t // 2)
    n_k = _cdiv(m, tm_t)
    tm = _round_up(_cdiv(m, n_k), 8)       # minimal-padding tile, multiple of 8
    m_pad = n_k * tm
    return tm, tn, m_pad, n_pad, n_i, n_k


def _pca_gram_kernel(ti_ref, tj_ref,            # scalar prefetch (SMEM): tile-pair ids
                     xi_ref, xj_ref,            # inputs: (tm, tn) row-block x feature-block
                     si_ref, sj_ref,            # inputs: (1, tn) f32 column sums (blocks i, j)
                     gram_ref,                  # output: (tn, tn) f32 Gram tile
                     acc_ref,                   # VMEM scratch: resident f32 accumulator
                     *, inv_m: float, center: bool):
    """Grid = (pair, k): accumulate one upper-triangular Gram tile over row blocks k."""
    k = pl.program_id(1)
    nk = pl.num_programs(1)

    @pl.when(k == 0)
    def _init():
        acc_ref[...] = jnp.zeros_like(acc_ref)

    # Gram tile: X_i^T @ X_j on the MXU with f32 accumulation.  Operands arrive
    # already in the MXU operand dtype (cast done once in HBM by the wrapper).
    acc_ref[...] += lax.dot_general(
        xi_ref[...], xj_ref[...],
        dimension_numbers=(((0,), (0,)), ((), ())),
        preferred_element_type=jnp.float32)

    @pl.when(k == nk - 1)
    def _finalize():
        g = acc_ref[...]
        if center:
            # One-pass centering identity: Xc_i^T Xc_j = X_i^T X_j - (1/M) s_i^T s_j.
            # NOTE: this can cancel catastrophically if column means dominate the
            # spread; f32 operands are the accuracy-safe default for that reason.
            corr = lax.dot_general(si_ref[...], sj_ref[...],
                                   dimension_numbers=(((0,), (0,)), ((), ())),
                                   preferred_element_type=jnp.float32)
            g = g - corr * inv_m
        gram_ref[...] = g


def pca_prepare(x2d: jax.Array, center_data: bool, *,
                operand_dtype=jnp.float32, tm_max: int = 2048, tn_max: int = 2048):
    """Pallas-computed (Gram matrix, column mean) of a 2-D data matrix.

    Returns (gram (N, N) f32, mean (N,) f32).  gram == Xc^T Xc when
    center_data=True (one-pass centering, no centered copy materialized),
    X^T X otherwise.
    """
    x2d = x2d.astype(jnp.float32)
    m, n = x2d.shape
    op_itemsize = jnp.dtype(operand_dtype).itemsize

    vmem_cap = _vmem_capacity_bytes()
    tm, tn, m_pad, n_pad, n_i, n_k = _select_tiles(m, n, op_itemsize, vmem_cap,
                                                   tm_max, tn_max)

    # Column sums: one cheap mem-bound pass in the wrapper (keeps the MXU free for
    # the Gram matmuls, and avoids recomputing the same sums once per tile pair).
    colsum = jnp.sum(x2d, axis=0, keepdims=True)            # (1, n) f32
    mean = colsum[0] / m
    colsum_pad = colsum
    if n_pad != n:
        colsum_pad = jnp.pad(colsum, ((0, 0), (0, n_pad - n)))

    x_pad = x2d
    if (m_pad, n_pad) != (m, n):
        x_pad = jnp.pad(x2d, ((0, m_pad - m), (0, n_pad - n)))
    # Cast once in HBM to the MXU operand dtype (bf16 halves HBM traffic + VMEM).
    x_op = x_pad.astype(operand_dtype)

    # Only upper-triangular Gram tiles (i <= j): G is symmetric -> ~2x fewer MXU flops.
    # Diagonal pairs DMA the same tile through both in_specs; accepted (only matters
    # for very small n_i).
    # TODO(synk): when n_i == 1 the single 'parallel' pair leaves one v7x TensorCore
    # idle; splitting the k reduction into a 2-way parallel axis would need reliable
    # core-count detection.
    pairs = [(i, j) for i in range(n_i) for j in range(i, n_i)]
    tile_i = jnp.asarray([p[0] for p in pairs], dtype=jnp.int32)
    tile_j = jnp.asarray([p[1] for p in pairs], dtype=jnp.int32)
    n_pairs = len(pairs)

    def _serp_k(p, k):
        # Serpentine the row-block order across pairs so the shared X_i block index
        # is unchanged at pair boundaries (Pallas skips the redundant re-DMA).
        if n_k <= 1:
            return k
        return jnp.where(p % 2 == 0, k, n_k - 1 - k)

    kernel = partial(_pca_gram_kernel, inv_m=1.0 / m, center=bool(center_data))

    # Explicit VMEM budget derived from the actual footprint and the queried capacity
    # (default scoped limit is only 16 MiB on v5e / 32 MiB on v6e & v7x).
    footprint = (4 * tm * tn * op_itemsize      # 2 X tiles x double buffer
                 + 4 * tn * 4                   # 2 colsum rows x double buffer
                 + 2 * tn * tn * 4              # double-buffered output tile
                 + tn * tn * 4)                 # resident accumulator
    vmem_limit = min(int(vmem_cap) - (4 << 20), int(1.25 * footprint) + (4 << 20))
    vmem_limit = max(vmem_limit, 16 << 20)

    cost = pl.CostEstimate(
        flops=2 * m_pad * tn * tn * n_pairs,
        transcendentals=0,
        bytes_accessed=(2 * n_pairs * m_pad * tn * op_itemsize
                        + n_pairs * tn * tn * 4 + 4 * n_pad))

    grid_spec = pltpu.PrefetchScalarGridSpec(
        num_scalar_prefetch=2,
        grid=(n_pairs, n_k),                         # reduction (row) axis last
        in_specs=[
            pl.BlockSpec((tm, tn), lambda p, k, ti, tj: (_serp_k(p, k), ti[p])),
            pl.BlockSpec((tm, tn), lambda p, k, ti, tj: (_serp_k(p, k), tj[p])),
            pl.BlockSpec((1, tn), lambda p, k, ti, tj: (0, ti[p])),
            pl.BlockSpec((1, tn), lambda p, k, ti, tj: (0, tj[p])),
        ],
        out_specs=pl.BlockSpec((tn, tn), lambda p, k, ti, tj: (ti[p], tj[p])),
        scratch_shapes=[pltpu.VMEM((tn, tn), jnp.float32)],   # resident Gram accumulator
    )

    gram_pad = pl.pallas_call(
        kernel,
        out_shape=jax.ShapeDtypeStruct((n_pad, n_pad), jnp.float32),
        grid_spec=grid_spec,
        compiler_params=pltpu.CompilerParams(
            dimension_semantics=("parallel", "arbitrary"),    # pair axis megacore-shardable
            vmem_limit_bytes=vmem_limit),
        cost_estimate=cost,
    )(tile_i, tile_j, x_op, x_op, colsum_pad, colsum_pad)

    # Strictly-lower-triangular tiles are never written by the grid (uninitialized HBM);
    # the where-select below only ever *selects* written (upper) entries there, so the
    # garbage never enters arithmetic.  Single mirror pass (vs triu + triu.T + add).
    g = gram_pad[:n, :n]
    idx = jnp.arange(n)
    gram = jnp.where(idx[:, None] <= idx[None, :], g, g.T)
    return gram, mean


class PcaModule:
    """JAX/Pallas re-implementation of fl4health.model_bases.pca.PcaModule forward."""

    def __init__(self, low_rank: bool = False, full_svd: bool = False,
                 rank_estimation: int = 6, *, mxu_operand_dtype=jnp.float32) -> None:
        self.low_rank = low_rank
        self.full_svd = full_svd
        self.rank_estimation = rank_estimation
        # bf16 operands hit v5e/v6e/v7x MXU peak rate (f32 accumulation is kept), but
        # the Gram squaring + one-pass centering compound mantissa loss -> f32 is the
        # accuracy-safe default.
        self.mxu_operand_dtype = mxu_operand_dtype
        self.principal_components = None   # set by forward (module has no trainable weights)
        self.singular_values = None
        self.data_mean = None

    @staticmethod
    def maybe_reshape(x: jax.Array) -> jax.Array:
        x = x.astype(jnp.float32)
        if x.ndim == 2:
            # torch squeezes here, which silently drops a data axis when M == 1 or
            # N == 1; keep 2-D (identity for every non-degenerate input).
            return x
        return x.reshape(x.shape[0], -1)

    def forward(self, x: jax.Array, center_data: bool):
        x2d = self.maybe_reshape(x)
        gram, mean = pca_prepare(x2d, center_data,
                                 operand_dtype=self.mxu_operand_dtype)
        if center_data:
            self.data_mean = mean
        else:
            # Data must already be centered (mirrors the torch assert). Skipped under
            # jax.jit tracing, where the host-side bool() is not possible.
            try:
                is_centered = bool(jnp.allclose(mean, 0.0, atol=1e-6))
            except jax.errors.TracerBoolConversionError:
                is_centered = True  # TODO(synk): use jax.experimental.checkify under jit.
            assert is_centered, "Data is expected to be centered when center_data=False."

        m, n = x2d.shape
        # TODO(synk): the SVD/eigendecomposition iteration itself has no clean Pallas
        # equivalent; the Gram-matrix hot path runs in the kernel, eigh is plain JAX/XLA.
        eigvals, eigvecs = jnp.linalg.eigh(gram)
        eigvals = eigvals[::-1]                      # descending order
        eigvecs = eigvecs[:, ::-1]
        singular_values = jnp.sqrt(jnp.maximum(eigvals, 0.0))

        if self.low_rank:
            # TODO(synk): torch.pca_lowrank uses a randomized rank-q algorithm; here the
            # exact eigendecomposition is truncated to rank q instead.
            q = min(self.rank_estimation, m, n)
            principal_components = eigvecs[:, :q]
            singular_values = singular_values[:q]
        elif self.full_svd:
            principal_components = eigvecs           # (n, n), like vh.T of full SVD
            singular_values = singular_values[:min(m, n)]
        else:
            k = min(m, n)                            # reduced SVD shapes
            principal_components = eigvecs[:, :k]
            singular_values = singular_values[:k]

        self.principal_components = principal_components
        self.singular_values = singular_values
        return principal_components, singular_values


if __name__ == "__main__":
    key = jax.random.PRNGKey(0)
    # NCHW input (batch=32, channels=8, H=4, W=4) -> data matrix (32, 128):
    # feature dim is a multiple of 128, so all kernel outputs are lane-dense.
    x = jax.random.normal(key, (32, 8, 4, 4), dtype=jnp.float32)

    module = PcaModule(low_rank=False, full_svd=False)
    pcs, sv = module.forward(x, center_data=True)
    pcs, sv = jax.block_until_ready((pcs, sv))

    # Reference: plain-JAX SVD of the centered data matrix (singular values only;
    # singular vectors are defined only up to sign).
    x2 = x.reshape(x.shape[0], -1).astype(jnp.float32)
    xc_ref = x2 - jnp.mean(x2, axis=0, keepdims=True)
    s_ref = jnp.linalg.svd(xc_ref, compute_uv=False)
    assert pcs.shape == (128, 32) and sv.shape == (32,)
    assert bool(jnp.allclose(sv, s_ref, rtol=5e-2, atol=5e-2)), "singular values mismatch"
    assert bool(jnp.allclose(pcs.T @ pcs, jnp.eye(32), atol=1e-3)), "PCs not orthonormal"
    assert bool(jnp.allclose(module.data_mean, jnp.mean(x2, axis=0), atol=1e-4)), "mean mismatch"

    # Exercise the multi-tile path (feature padding, upper-triangular tile pairs,
    # multi-step serpentined row reduction) with deliberately small tiles on (48, 320).
    xb = jax.random.normal(jax.random.PRNGKey(1), (48, 320), dtype=jnp.float32)
    gram_b, mean_b = jax.block_until_ready(
        pca_prepare(xb, True, tm_max=16, tn_max=128))
    xbc = xb - jnp.mean(xb, axis=0, keepdims=True)
    assert bool(jnp.allclose(gram_b, xbc.T @ xbc, rtol=1e-3, atol=1e-2)), "tiled Gram mismatch"
    assert bool(jnp.allclose(mean_b, jnp.mean(xb, axis=0), atol=1e-4)), "tiled mean mismatch"

    # bf16 HBM-operand path (MXU peak rate, f32 accumulation); loose accuracy check.
    gram_bf16, _ = jax.block_until_ready(
        pca_prepare(x2, True, operand_dtype=jnp.bfloat16))
    gram_f32, _ = pca_prepare(x2, True)
    assert bool(jnp.all(jnp.isfinite(gram_bf16)))
    assert bool(jnp.allclose(gram_bf16, gram_f32, atol=2.0)), "bf16 Gram too far from f32"

    print("KERNEL_OK")
</pallas_src>

<mosaic_0001>
module attributes {stable_mosaic.version = 11 : i64} {
  func.func @_pca_gram_kernel(%arg0: i32, %arg1: i32, %arg2: memref<1xi32, #tpu.memory_space<smem>>, %arg3: memref<1xi32, #tpu.memory_space<smem>>, %arg4: memref<32x128xf32, #tpu.memory_space<vmem>>, %arg5: memref<32x128xf32, #tpu.memory_space<vmem>>, %arg6: memref<1x128xf32, #tpu.memory_space<vmem>>, %arg7: memref<1x128xf32, #tpu.memory_space<vmem>>, %arg8: memref<128x128xf32, #tpu.memory_space<vmem>>, %arg9: memref<128x128xf32, #tpu.memory_space<vmem>>) attributes {dimension_semantics = [#tpu.dimension_semantics<parallel>, #tpu.dimension_semantics<arbitrary>], iteration_bounds = array<i64: 1, 1>, scalar_prefetch = 2 : i64, scratch_operands = 1 : i64, tpu.core_type = #tpu.core_type<tc>, window_params = [{transform_indices = @transform_0, window_bounds = array<i64: 32, 128>}, {transform_indices = @transform_1, window_bounds = array<i64: 32, 128>}, {transform_indices = @transform_2, window_bounds = array<i64: 1, 128>}, {transform_indices = @transform_3, window_bounds = array<i64: 1, 128>}, {transform_indices = @transform_4, window_bounds = array<i64: 128, 128>}]} {
    %c0_i32 = arith.constant 0 : i32
    %0 = arith.cmpi eq, %arg1, %c0_i32 : i32
    %1 = arith.extui %0 : i1 to i32
    %c0_i32_0 = arith.constant 0 : i32
    %2 = arith.cmpi ne, %1, %c0_i32_0 : i32
    scf.if %2 {
      %cst_10 = arith.constant 0.000000e+00 : f32
      %12 = vector.broadcast %cst_10 : f32 to vector<128x128xf32>
      %c0_11 = arith.constant 0 : index
      %c0_12 = arith.constant 0 : index
      %13 = vector.load %arg9[%c0_11, %c0_12] : memref<128x128xf32, #tpu.memory_space<vmem>>, vector<128x128xf32>
      tpu.vector_store %arg9[%c0_11, %c0_12], %12 {strides = array<i32>} : memref<128x128xf32, #tpu.memory_space<vmem>>, vector<128x128xf32>,
    } else {
    }
    %c0 = arith.constant 0 : index
    %c0_1 = arith.constant 0 : index
    %3 = vector.load %arg9[%c0, %c0_1] : memref<128x128xf32, #tpu.memory_space<vmem>>, vector<128x128xf32>
    %c0_2 = arith.constant 0 : index
    %c0_3 = arith.constant 0 : index
    %4 = vector.load %arg4[%c0_2, %c0_3] : memref<32x128xf32, #tpu.memory_space<vmem>>, vector<32x128xf32>
    %c0_4 = arith.constant 0 : index
    %c0_5 = arith.constant 0 : index
    %5 = vector.load %arg5[%c0_4, %c0_5] : memref<32x128xf32, #tpu.memory_space<vmem>>, vector<32x128xf32>
    %cst = arith.constant dense<0.000000e+00> : vector<128x128xf32>
    %6 = tpu.matmul %4, %5, %cst {dimension_numbers = #tpu.dot_dimension_numbers<[0], [0], [1], [1], [0, 1, 1, 1], [], []>} : vector<32x128xf32>, vector<32x128xf32>, vector<128x128xf32> -> vector<128x128xf32>
    %7 = arith.addf %3, %6 : vector<128x128xf32>
    %c0_6 = arith.constant 0 : index
    %c0_7 = arith.constant 0 : index
    %8 = vector.load %arg9[%c0_6, %c0_7] : memref<128x128xf32, #tpu.memory_space<vmem>>, vector<128x128xf32>
    tpu.vector_store %arg9[%c0_6, %c0_7], %7 {strides = array<i32>} : memref<128x128xf32, #tpu.memory_space<vmem>>, vector<128x128xf32>,
    %c0_i32_8 = arith.constant 0 : i32
    %9 = arith.cmpi eq, %arg1, %c0_i32_8 : i32
    %10 = arith.extui %9 : i1 to i32
    %c0_i32_9 = arith.constant 0 : i32
    %11 = arith.cmpi ne, %10, %c0_i32_9 : i32
    scf.if %11 {
      %c0_10 = arith.constant 0 : index
      %c0_11 = arith.constant 0 : index
      %12 = vector.load %arg9[%c0_10, %c0_11] : memref<128x128xf32, #tpu.memory_space<vmem>>, vector<128x128xf32>
      %c0_12 = arith.constant 0 : index
      %c0_13 = arith.constant 0 : index
      %13 = vector.load %arg6[%c0_12, %c0_13] : memref<1x128xf32, #tpu.memory_space<vmem>>, vector<1x128xf32>
      %c0_14 = arith.constant 0 : index
      %c0_15 = arith.constant 0 : index
      %14 = vector.load %arg7[%c0_14, %c0_15] : memref<1x128xf32, #tpu.memory_space<vmem>>, vector<1x128xf32>
      %cst_16 = arith.constant dense<0.000000e+00> : vector<128x128xf32>
      %15 = tpu.matmul %13, %14, %cst_16 {dimension_numbers = #tpu.dot_dimension_numbers<[0], [0], [1], [1], [0, 1, 1, 1], [], []>} : vector<1x128xf32>, vector<1x128xf32>, vector<128x128xf32> -> vector<128x128xf32>
      %cst_17 = arith.constant 3.125000e-02 : f32
      %16 = vector.broadcast %cst_17 : f32 to vector<128x128xf32>
      %17 = arith.mulf %15, %16 : vector<128x128xf32>
      %18 = arith.subf %12, %17 : vector<128x128xf32>
      %c0_18 = arith.constant 0 : index
      %c0_19 = arith.constant 0 : index
      %19 = vector.load %arg8[%c0_18, %c0_19] : memref<128x128xf32, #tpu.memory_space<vmem>>, vector<128x128xf32>
      tpu.vector_store %arg8[%c0_18, %c0_19], %18 {strides = array<i32>} : memref<128x128xf32, #tpu.memory_space<vmem>>, vector<128x128xf32>,
    } else {
    }
    return
  }
  func.func @transform_0(%arg0: i32, %arg1: i32, %arg2: memref<1xi32, #tpu.memory_space<smem>>, %arg3: memref<1xi32, #tpu.memory_space<smem>>) -> (i32, i32) {
    %0 = arith.index_cast %arg0 : i32 to index
    %1 = memref.load %arg2[%0] : memref<1xi32, #tpu.memory_space<smem>>
    %c0_i32 = arith.constant 0 : i32
    return %arg1, %1 : i32, i32
  }
  func.func @transform_1(%arg0: i32, %arg1: i32, %arg2: memref<1xi32, #tpu.memory_space<smem>>, %arg3: memref<1xi32, #tpu.memory_space<smem>>) -> (i32, i32) {
    %0 = arith.index_cast %arg0 : i32 to index
    %1 = memref.load %arg3[%0] : memref<1xi32, #tpu.memory_space<smem>>
    %c0_i32 = arith.constant 0 : i32
    return %arg1, %1 : i32, i32
  }
  func.func @transform_2(%arg0: i32, %arg1: i32, %arg2: memref<1xi32, #tpu.memory_space<smem>>, %arg3: memref<1xi32, #tpu.memory_space<smem>>) -> (i32, i32) {
    %0 = arith.index_cast %arg0 : i32 to index
    %1 = memref.load %arg2[%0] : memref<1xi32, #tpu.memory_space<smem>>
    %c0_i32 = arith.constant 0 : i32
    %c0_i32_0 = arith.constant 0 : i32
    return %c0_i32, %1 : i32, i32
  }
  func.func @transform_3(%arg0: i32, %arg1: i32, %arg2: memref<1xi32, #tpu.memory_space<smem>>, %arg3: memref<1xi32, #tpu.memory_space<smem>>) -> (i32, i32) {
    %0 = arith.index_cast %arg0 : i32 to index
    %1 = memref.load %arg3[%0] : memref<1xi32, #tpu.memory_space<smem>>
    %c0_i32 = arith.constant 0 : i32
    %c0_i32_0 = arith.constant 0 : i32
    return %c0_i32, %1 : i32, i32
  }
  func.func @transform_4(%arg0: i32, %arg1: i32, %arg2: memref<1xi32, #tpu.memory_space<smem>>, %arg3: memref<1xi32, #tpu.memory_space<smem>>) -> (i32, i32) {
    %0 = arith.index_cast %arg0 : i32 to index
    %1 = memref.load %arg2[%0] : memref<1xi32, #tpu.memory_space<smem>>
    %2 = arith.index_cast %arg0 : i32 to index
    %3 = memref.load %arg3[%2] : memref<1xi32, #tpu.memory_space<smem>>
    %c0_i32 = arith.constant 0 : i32
    return %1, %3 : i32, i32
  }
}

</mosaic_0001>

<bundles_post_ra>
// kernel: tpu_custom_call.1
= control target key start
LH: loop header
LB: loop body
LE: loop exit
PB: predicated region body
PF: predicated region fallthrough
CT: control target
= control target key end

     0   :  { %13 = vsyncpa [#allocation7], 0  ;;  %s1090_s0 = inlined_call_operand.<no memory space> [shape: s32[1], index: 0, kind: input, shape index: {}]   ;;  %s1091_s1 = inlined_call_operand.<no memory space> [shape: s32[1], index: 1, kind: input, shape index: {}]   ;;  %s1092_s2 = inlined_call_operand.hbm [shape: f32[32,128], index: 2, kind: input, shape index: {}]   ;;  %s1093_s3 = inlined_call_operand.hbm [shape: f32[32,128], index: 3, kind: input, shape index: {}]   ;;  %s1094_s4 = inlined_call_operand.vmem [shape: f32[1,128], index: 4, kind: input, shape index: {}]   ;;  %s1095_s5 = inlined_call_operand.vmem [shape: f32[1,128], index: 5, kind: input, shape index: {}]   ;;  %s1096_s6 = inlined_call_operand.hbm [shape: f32[128,128], index: 6, kind: output, shape index: {}]  }
   0x1   :  { %14 = vsyncpa [#allocation10], 0 }
   0x2   :  { %15 = vsyncpa [#allocation8], 0  ;;  %s728_s23 = sshll.u32 %s1090_s0, 7  ;;  %s952_s27 = smov [#allocation6]  }
   0x3   :  { %s23_s26 = scalar_lea.hbm %s1092_s2, %s728_s23  ;;  %s24_s28 = sshll.u32 %s952_s27, 4  ;;  %s25_s28 = int_to_ptr.vmem [resolvable:$true] %s24_s28 }
   0x4   :  { %s729_s7 = sshll.u32 %s1091_s1, 7  ;;  %s874_s8 = scalar_lea.hbm %s23_s26, 512 }
   0x5   :  { %p875_p0 = scmp.ne.s32.totalorder %s23_s26, %s874_s8  ;;  %s876_s11 = scalar_lea.hbm %s1092_s2, 512 }
   0x6   :  { %p877_p1 = scmp.lt.u32.totalorder %s23_s26, %s1092_s2  ;;  %p878_p2 = scmp.lt.u32.totalorder %s876_s11, %s874_s8 }
   0x7   :  { %p880_p4 = scmp.lt.u32.totalorder %s874_s8, %s23_s26 }
   0x8   :  { %p879_p3 = por %p878_p2, %p877_p1 }
   0xa   :  { %p881_p5 = por %p880_p4, %p879_p3 }
   0xc   :  { %p882_p6 = pnand %p881_p5, %p875_p0 }
   0xe   :  { %885 = shalt.err (!%p882_p6)
}
   0xf   :  { %s886_s14 = scalar_lea.vmem %s25_s28, 512  ;;  %p891_p8 = scmp.lt.s32.totalorder %s25_s28, %s25_s28 }
  0x10   :  { %p887_p7 = scmp.ne.s32.totalorder %s25_s28, %s886_s14  ;;  %p892_p9 = scmp.lt.s32.totalorder %s886_s14, %s886_s14 }
  0x12   :  { %p893_p10 = por %p892_p9, %p891_p8 }
  0x14   :  { %p894_p11 = pnand %p893_p10, %p887_p7 }
  0x16   :  { %897 = shalt.err (!%p894_p11)
}
  0x17   :  { %s953_s15 = smov 128   ;;  %s954_s16 = smov 8  }
  0x18   :  { %30 = dma.hbm_to_vmem [thread:$0]  %s23_s26, 512, %s25_s28, [#allocation7], %s953_s15, %s953_s15, %s954_s16  }
  0x19   :  { %s38_s18 = scalar_lea.hbm %s1093_s3, %s729_s7  ;;  %s955_s19 = smov [#allocation9]  }
  0x1a   :  { %s39_s20 = sshll.u32 %s955_s19, 4  ;;  %s898_s21 = scalar_lea.hbm %s38_s18, 512  ;;  %s40_s20 = int_to_ptr.vmem [resolvable:$true] %s39_s20 }
  0x1b   :  { %p899_p12 = scmp.ne.s32.totalorder %s38_s18, %s898_s21  ;;  %s900_s24 = scalar_lea.hbm %s1093_s3, 512 }
  0x1c   :  { %p901_p13 = scmp.lt.u32.totalorder %s38_s18, %s1093_s3  ;;  %p902_p0 = scmp.lt.u32.totalorder %s900_s24, %s898_s21 }
  0x1d   :  { %p904_p2 = scmp.lt.u32.totalorder %s898_s21, %s38_s18 }
  0x1e   :  { %p903_p1 = por %p902_p0, %p901_p13 }
  0x20   :  { %p905_p3 = por %p904_p2, %p903_p1 }
  0x22   :  { %p906_p4 = pnand %p905_p3, %p899_p12 }
  0x24   :  { %909 = shalt.err (!%p906_p4)
}
  0x25   :  { %s910_s26 = scalar_lea.vmem %s40_s20, 512  ;;  %p915_p6 = scmp.lt.s32.totalorder %s40_s20, %s40_s20 }
  0x26   :  { %p911_p5 = scmp.ne.s32.totalorder %s40_s20, %s910_s26  ;;  %p916_p7 = scmp.lt.s32.totalorder %s910_s26, %s910_s26 }
  0x28   :  { %p917_p8 = por %p916_p7, %p915_p6 }
  0x2a   :  { %p918_p9 = pnand %p917_p8, %p911_p5 }
  0x2c   :  { %921 = shalt.err (!%p918_p9)
}
  0x2d   :  { %45 = dma.hbm_to_vmem [thread:$0]  %s38_s18, 512, %s40_s20, [#allocation10], %s953_s15, %s953_s15, %s954_s16  }
  0x2e   :  { %946 = dma.done.wait [#allocation7], 512  }
  0x2f   :  { %947 = vsyncadd [#allocation7], 4294966784 }
  0x30   :  { %948 = dma.done.wait [#allocation10], 512  }
  0x31   :  { %949 = vsyncadd [#allocation10], 4294966784  ;;  %p77_p10 = scmp.lt.s32.totalorder %s1090_s0, 0  ;;  %p82_p11 = scmp.lt.s32.totalorder %s1091_s1, 0  ;;  %vm493_vm0 = vcmask 1040384   ;;  %v125_v2 = vld [vmem:[#allocation6] sm:$0xff] }
  0x32   :  { %v129_v3 = vld [vmem:[#allocation9] sm:$0xff]  ;;  %v130_v4 = vld [vmem:[#allocation9 + $0x8] sm:$0xff]  ;;  %v131_v7 = vld [vmem:[#allocation9 + $0x10] sm:$0xff]  ;;  %vm444_vm1 = vcmask 7168   ;;  %vm165_vm2 = vcmask 261120   ;;  %s763_s20 = sshll.u32 %s1090_s0, 4 }
  0x33   :  { %s78_s7 = scalar_select %p77_p10, %s1090_s0, 0  ;;  %v860_v5 = vpack.c.bf16 %v130_v4, %v129_v3  ;;  %v126_v6 = vld [vmem:[#allocation6 + $0x8] sm:$0xff]  ;;  %v132_v8 = vld [vmem:[#allocation9 + $0x18] sm:$0xff]  ;;  %v127_v10 = vld [vmem:[#allocation6 + $0x10] sm:$0xff] }
  0x34   :  { %s83_s2 = scalar_select %p82_p11, %s1091_s1, 0  ;;  %v864_v9 = vpack.c.bf16 %v132_v8, %v131_v7  ;;  %v128_v11 = vld [vmem:[#allocation6 + $0x18] sm:$0xff] }
  0x35   :  { %s79_s10 = scalar_lea.vmem %s1094_s4, %s78_s7  ;;  %861 = vmatprep.subr.bf16.mxu0 %v860_v5  ;;  %s698_s23 = sadd.s32 %s763_s20, %s1091_s1 }
  0x36   :  { %v410_v0 = vld [vmem:[%s79_s10] sm:$0x1]  ;;  %s84_s19 = scalar_lea.vmem %s1095_s5, %s83_s2  ;;  %863 = vmatpush3.bf16.msra.mxu0 %v860_v5  ;;  %s764_s24 = sshll.u32 %s698_s23, 7 }
  0x37   :  { %412 = vxpose.xlu0.b32.start.end [1/1] (short) %v410_v0, 128  ;;  %v411_v1 = vld [vmem:[%s84_s19] sm:$0x1]  ;;  %865 = vmatprep.subr.bf16.mxu0 %v864_v9  ;;  %s956_s25 = smov [#allocation11]   ;;  %s700_s0 = scalar_lea.hbm %s1096_s6, %s764_s24 }
  0x38   :  { %834 = vmatprep.subr.msk.mxu1 %vm493_vm0, %v411_v1  ;;  %s701_s27 = sshll.u32 %s956_s25, 4  ;;  %s702_s27 = int_to_ptr.vmem [resolvable:$true] %s701_s27 }
  0x39   :  { %835 = vmatpush3.msk.msra.mxu1 %vm493_vm0, %v411_v1  ;;  %s922_s28 = scalar_lea.vmem %s702_s27, 2048  ;;  %p927_p13 = scmp.lt.s32.totalorder %s702_s27, %s702_s27 }
  0x3a   :  { %867 = vmatpush3.bf16.msra.mxu0 %v864_v9  ;;  %p923_p12 = scmp.ne.s32.totalorder %s702_s27, %s922_s28  ;;  %p928_p0 = scmp.lt.s32.totalorder %s922_s28, %s922_s28 }
  0x3c   :  { %p929_p1 = por %p928_p0, %p927_p13 }
  0x3e   :  { %p930_p2 = pnand %p929_p1, %p923_p12 }
  0x74   :  { %133 = vxpose.xlu0.b32.start [1/4] (short) %v125_v2, 128 }
  0x78   :  { %134 = vxpose.xlu0.b32.cont [2/4] (short) %v126_v6, 128 }
  0x7c   :  { %135 = vxpose.xlu0.b32.cont [3/4] (short) %v127_v10, 128 }
  0x80   :  { %136 = vxpose.xlu0.b32.end [4/4] (short) %v128_v11, 128 }
  0xb7   :  { %v428_v12 = vpop.trf.xlu0 }
  0xb8   :  { %836 = vmatprep.mubr.msk.f32.mxu1 %vm444_vm1, %v428_v12 }
  0xbb   :  { %v429_v13 = vpop.trf.xlu0 }
  0xbc   :  { %837 = vmatmul.mubr.msk.f32.vlgmr.msra.gmra.mrb[0].mxu1 %vm444_vm1, %v429_v13 }
  0xbf   :  { %v430_v14 = vpop.trf.xlu0 }
  0xc0   :  { %839 = vmatprep.mubr.msk.f32.mxu1 %vm444_vm1, %v430_v14 }
  0xc3   :  { %v431_v15 = vpop.trf.xlu0 }
  0xc4   :  { %840 = vmatmul.mubr.msk.f32.gmra.mrb[2].mxu1 %vm444_vm1, %v431_v15 }
  0xc7   :  { %v432_v16 = vpop.trf.xlu0 }
  0xc8   :  { %842 = vmatprep.mubr.msk.f32.mxu1 %vm444_vm1, %v432_v16 }
  0xcb   :  { %v433_v17 = vpop.trf.xlu0 }
  0xcc   :  { %843 = vmatmul.mubr.msk.f32.gmra.mrb[4].mxu1 %vm444_vm1, %v433_v17 }
  0xcf   :  { %v434_v18 = vpop.trf.xlu0 }
  0xd0   :  { %845 = vmatprep.mubr.msk.f32.mxu1 %vm444_vm1, %v434_v18 }
  0xd3   :  { %v435_v19 = vpop.trf.xlu0 }
  0xd4   :  { %846 = vmatmul.mubr.msk.f32.gmra.mrb[6].mxu1 %vm444_vm1, %v435_v19 }
  0xd7   :  { %v436_v20 = vpop.trf.xlu0 }
  0xd8   :  { %848 = vmatprep.mubr.msk.f32.mxu1 %vm444_vm1, %v436_v20 }
  0xdb   :  { %v437_v21 = vpop.trf.xlu0 }
  0xdc   :  { %849 = vmatmul.mubr.msk.f32.gmra.mrb[8].mxu1 %vm444_vm1, %v437_v21 }
  0xdf   :  { %v438_v22 = vpop.trf.xlu0 }
  0xe0   :  { %851 = vmatprep.mubr.msk.f32.mxu1 %vm444_vm1, %v438_v22 }
  0xe3   :  { %v439_v23 = vpop.trf.xlu0 }
  0xe4   :  { %852 = vmatmul.mubr.msk.f32.gmra.mrb[10].mxu1 %vm444_vm1, %v439_v23 }
  0xe7   :  { %v440_v24 = vpop.trf.xlu0 }
  0xe8   :  { %854 = vmatprep.mubr.msk.f32.mxu1 %vm444_vm1, %v440_v24 }
  0xeb   :  { %v441_v25 = vpop.trf.xlu0 }
  0xec   :  { %855 = vmatmul.mubr.msk.f32.gmra.mrb[12].mxu1 %vm444_vm1, %v441_v25 }
  0xef   :  { %v442_v26 = vpop.trf.xlu0 }
  0xf0   :  { %857 = vmatprep.mubr.msk.f32.mxu1 %vm444_vm1, %v442_v26 }
  0xf3   :  { %v443_v27 = vpop.trf.xlu0 }
  0xf4   :  { %858 = vmatmul.mubr.msk.f32.gmra.mrb[14].mxu1 %vm444_vm1, %v443_v27 }
  0xf7   :  { %v149_v28 = vpop.trf.xlu0 }
  0xf8   :  { %810 = vmatprep.mubr.msk.f32.mxu0 %vm165_vm2, %v149_v28 }
  0xfb   :  { %v150_v29 = vpop.trf.xlu0 }
  0xfc   :  { %811 = vmatmul.mubr.msk.f32.vlgmr.msra.gmra.mrb[0].mxu0 %vm165_vm2, %v150_v29 }
  0xff   :  { %v151_v30 = vpop.trf.xlu0 }
 0x100   :  { %813 = vmatprep.mubr.msk.f32.mxu0 %vm165_vm2, %v151_v30 }
 0x103   :  { %v152_v31 = vpop.trf.xlu0 }
 0x104   :  { %814 = vmatmul.mubr.msk.f32.gmra.mrb[2].mxu0 %vm165_vm2, %v152_v31 }
 0x107   :  { %v153_v32 = vpop.trf.xlu0 }
 0x108   :  { %816 = vmatprep.mubr.msk.f32.mxu0 %vm165_vm2, %v153_v32 }
 0x10b   :  { %v154_v33 = vpop.trf.xlu0 }
 0x10c   :  { %817 = vmatmul.mubr.msk.f32.gmra.mrb[4].mxu0 %vm165_vm2, %v154_v33 }
 0x10f   :  { %v155_v34 = vpop.trf.xlu0 }
 0x110   :  { %819 = vmatprep.mubr.msk.f32.mxu0 %vm165_vm2, %v155_v34 }
 0x113   :  { %v156_v35 = vpop.trf.xlu0 }
 0x114   :  { %820 = vmatmul.mubr.msk.f32.gmra.mrb[6].mxu0 %vm165_vm2, %v156_v35 }
 0x117   :  { %v157_v36 = vpop.trf.xlu0 }
 0x118   :  { %822 = vmatprep.mubr.msk.f32.mxu0 %vm165_vm2, %v157_v36 }
 0x11b   :  { %v158_v37 = vpop.trf.xlu0 }
 0x11c   :  { %823 = vmatmul.mubr.msk.f32.gmra.mrb[8].mxu0 %vm165_vm2, %v158_v37 }
 0x11f   :  { %v159_v38 = vpop.trf.xlu0 }
 0x120   :  { %825 = vmatprep.mubr.msk.f32.mxu0 %vm165_vm2, %v159_v38 }
 0x123   :  { %v160_v39 = vpop.trf.xlu0 }
 0x124   :  { %826 = vmatmul.mubr.msk.f32.gmra.mrb[10].mxu0 %vm165_vm2, %v160_v39 }
 0x127   :  { %v161_v40 = vpop.trf.xlu0 }
 0x128   :  { %828 = vmatprep.mubr.msk.f32.mxu0 %vm165_vm2, %v161_v40 }
 0x12b   :  { %v162_v41 = vpop.trf.xlu0 }
 0x12c   :  { %829 = vmatmul.mubr.msk.f32.gmra.mrb[12].mxu0 %vm165_vm2, %v162_v41 }
 0x12f   :  { %v163_v42 = vpop.trf.xlu0 }
 0x130   :  { %831 = vmatprep.mubr.msk.f32.mxu0 %vm165_vm2, %v163_v42 }
 0x133   :  { %v164_v43 = vpop.trf.xlu0 }
 0x134   :  { %832 = vmatmul.mubr.msk.f32.gmra.mrb[14].mxu0 %vm165_vm2, %v164_v43 }
 0x18f   :  { %v838_v44 = vpop.f32.mrb[0].mxu1 }
 0x190   :  { %v563_v45 = vpop.f32.mrb[1].mxu1  ;;  %v643_v60 = vmul.f32 0.03125, %v838_v44 }
 0x191   :  { %v642_v61 = vmul.f32 0.03125, %v563_v45 }
 0x197   :  { %v841_v46 = vpop.f32.mrb[2].mxu1 }
 0x198   :  { %v573_v47 = vpop.f32.mrb[3].mxu1  ;;  %v645_v2 = vmul.f32 0.03125, %v841_v46 }
 0x199   :  { %v644_v3 = vmul.f32 0.03125, %v573_v47 }
 0x19f   :  { %v844_v48 = vpop.f32.mrb[4].mxu1 }
 0x1a0   :  { %v583_v49 = vpop.f32.mrb[5].mxu1  ;;  %v647_v8 = vmul.f32 0.03125, %v844_v48 }
 0x1a1   :  { %v646_v9 = vmul.f32 0.03125, %v583_v49 }
 0x1a7   :  { %v847_v50 = vpop.f32.mrb[6].mxu1 }
 0x1a8   :  { %v593_v51 = vpop.f32.mrb[7].mxu1  ;;  %v649_v14 = vmul.f32 0.03125, %v847_v50 }
 0x1a9   :  { %v648_v15 = vmul.f32 0.03125, %v593_v51 }
 0x1af   :  { %v850_v52 = vpop.f32.mrb[8].mxu1 }
 0x1b0   :  { %v603_v53 = vpop.f32.mrb[9].mxu1  ;;  %v651_v20 = vmul.f32 0.03125, %v850_v52 }
 0x1b1   :  { %v650_v21 = vmul.f32 0.03125, %v603_v53 }
 0x1b7   :  { %v853_v54 = vpop.f32.mrb[10].mxu1 }
 0x1b8   :  { %v613_v55 = vpop.f32.mrb[11].mxu1  ;;  %v653_v26 = vmul.f32 0.03125, %v853_v54 }
 0x1b9   :  { %v652_v27 = vmul.f32 0.03125, %v613_v55 }
 0x1bf   :  { %v856_v56 = vpop.f32.mrb[12].mxu1 }
 0x1c0   :  { %v623_v57 = vpop.f32.mrb[13].mxu1  ;;  %v655_v32 = vmul.f32 0.03125, %v856_v56 }
 0x1c1   :  { %v654_v33 = vmul.f32 0.03125, %v623_v57 }
 0x1c7   :  { %v859_v58 = vpop.f32.mrb[14].mxu1 }
 0x1c8   :  { %v633_v59 = vpop.f32.mrb[15].mxu1  ;;  %v657_v38 = vmul.f32 0.03125, %v859_v58 }
 0x1c9   :  { %v656_v39 = vmul.f32 0.03125, %v633_v59 }
 0x1cf   :  { %v812_v62 = vpop.f32.mrb[0].mxu0 }
 0x1d0   :  { %v659_v63 = vsub.f32 %v812_v62, %v643_v60  ;;  %v280_v0 = vpop.f32.mrb[1].mxu0 }
 0x1d1   :  { %v658_v1 = vsub.f32 %v280_v0, %v642_v61 }
 0x1d2   :  { %675 = vst [vmem:[#allocation11 + $0x8] sm:$0xff] %v659_v63 }
 0x1d3   :  { %674 = vst [vmem:[#allocation11] sm:$0xff] %v658_v1 }
 0x1d7   :  { %v815_v4 = vpop.f32.mrb[2].mxu0 }
 0x1d8   :  { %v661_v5 = vsub.f32 %v815_v4, %v645_v2  ;;  %v290_v6 = vpop.f32.mrb[3].mxu0 }
 0x1d9   :  { %v660_v7 = vsub.f32 %v290_v6, %v644_v3 }
 0x1da   :  { %677 = vst [vmem:[#allocation11 + $0x18] sm:$0xff] %v661_v5 }
 0x1db   :  { %676 = vst [vmem:[#allocation11 + $0x10] sm:$0xff] %v660_v7 }
 0x1df   :  { %v818_v10 = vpop.f32.mrb[4].mxu0 }
 0x1e0   :  { %v663_v11 = vsub.f32 %v818_v10, %v647_v8  ;;  %v300_v12 = vpop.f32.mrb[5].mxu0 }
 0x1e1   :  { %v662_v13 = vsub.f32 %v300_v12, %v646_v9 }
 0x1e2   :  { %679 = vst [vmem:[#allocation11 + $0x28] sm:$0xff] %v663_v11 }
 0x1e3   :  { %678 = vst [vmem:[#allocation11 + $0x20] sm:$0xff] %v662_v13 }
 0x1e7   :  { %v821_v16 = vpop.f32.mrb[6].mxu0 }
 0x1e8   :  { %v665_v17 = vsub.f32 %v821_v16, %v649_v14  ;;  %v310_v18 = vpop.f32.mrb[7].mxu0 }
 0x1e9   :  { %v664_v19 = vsub.f32 %v310_v18, %v648_v15 }
 0x1ea   :  { %681 = vst [vmem:[#allocation11 + $0x38] sm:$0xff] %v665_v17 }
 0x1eb   :  { %680 = vst [vmem:[#allocation11 + $0x30] sm:$0xff] %v664_v19 }
 0x1ef   :  { %v824_v22 = vpop.f32.mrb[8].mxu0 }
 0x1f0   :  { %v667_v23 = vsub.f32 %v824_v22, %v651_v20  ;;  %v320_v24 = vpop.f32.mrb[9].mxu0 }
 0x1f1   :  { %v666_v25 = vsub.f32 %v320_v24, %v650_v21 }
 0x1f2   :  { %683 = vst [vmem:[#allocation11 + $0x48] sm:$0xff] %v667_v23 }
 0x1f3   :  { %682 = vst [vmem:[#allocation11 + $0x40] sm:$0xff] %v666_v25 }
 0x1f7   :  { %v827_v28 = vpop.f32.mrb[10].mxu0 }
 0x1f8   :  { %v669_v29 = vsub.f32 %v827_v28, %v653_v26  ;;  %v330_v30 = vpop.f32.mrb[11].mxu0 }
 0x1f9   :  { %v668_v31 = vsub.f32 %v330_v30, %v652_v27 }
 0x1fa   :  { %685 = vst [vmem:[#allocation11 + $0x58] sm:$0xff] %v669_v29 }
 0x1fb   :  { %684 = vst [vmem:[#allocation11 + $0x50] sm:$0xff] %v668_v31 }
 0x1ff   :  { %v830_v34 = vpop.f32.mrb[12].mxu0 }
 0x200   :  { %v671_v35 = vsub.f32 %v830_v34, %v655_v32  ;;  %v340_v36 = vpop.f32.mrb[13].mxu0 }
 0x201   :  { %v670_v37 = vsub.f32 %v340_v36, %v654_v33 }
 0x202   :  { %687 = vst [vmem:[#allocation11 + $0x68] sm:$0xff] %v671_v35 }
 0x203   :  { %686 = vst [vmem:[#allocation11 + $0x60] sm:$0xff] %v670_v37 }
 0x207   :  { %v833_v40 = vpop.f32.mrb[14].mxu0 }
 0x208   :  { %v673_v41 = vsub.f32 %v833_v40, %v657_v38  ;;  %v350_v42 = vpop.f32.mrb[15].mxu0 }
 0x209   :  { %v672_v43 = vsub.f32 %v350_v42, %v656_v39 }
 0x20a   :  { %689 = vst [vmem:[#allocation11 + $0x78] sm:$0xff] %v673_v41 }
 0x20b   :  { %688 = vst [vmem:[#allocation11 + $0x70] sm:$0xff] %v672_v43 }
 0x20c   :  { %933 = shalt.err (!%p930_p2)
}
 0x20d   :  { %s934_s1 = scalar_lea.hbm %s700_s0, 2048  ;;  %s936_s7 = scalar_lea.hbm %s1096_s6, 2048 }
 0x20e   :  { %p935_p3 = scmp.ne.s32.totalorder %s700_s0, %s934_s1  ;;  %p937_p4 = scmp.lt.u32.totalorder %s700_s0, %s1096_s6 }
 0x20f   :  { %p938_p5 = scmp.lt.u32.totalorder %s936_s7, %s934_s1  ;;  %p940_p7 = scmp.lt.u32.totalorder %s934_s1, %s700_s0 }
 0x211   :  { %p939_p6 = por %p938_p5, %p937_p4 }
 0x213   :  { %p941_p8 = por %p940_p7, %p939_p6 }
 0x215   :  { %p942_p9 = pnand %p941_p8, %p935_p3 }
 0x217   :  { %945 = shalt.err (!%p942_p9)
}
 0x218   :  { %707 = dma.vmem_to_hbm [thread:$0]  %s702_s27, 2048, %s700_s0, [#allocation8], %s953_s15, %s953_s15, %s954_s16  }
 0x219   :  { %950 = dma.done.wait [#allocation8], 2048  }
 0x21a   :  { %951 = vsyncadd [#allocation8], 4294965248 }
 0x21b   :  { %711 = vsyncpa [#allocation7], 1 }
 0x21c   :  { %712 = vsyncpa [#allocation10], 1 }
 0x21d   :  { %713 = vsyncpa [#allocation8], 1 }

</bundles_post_ra>
